<compile_context>
chip_gen: v6e
topology: v6e:2x2x1
jax: 0.10.0
libtpu: 0.0.40
codegen_flags: <defaults>
</compile_context>

<pallas_src>
import functools

import jax
import jax.numpy as jnp
from jax import lax
from jax.experimental import pallas as pl
from jax.experimental.pallas import tpu as pltpu


def _round_up(x, mult):
    return ((x + mult - 1) // mult) * mult


def _euclid_dist_kernel(x_ref, y_ref, xx_ref, yy_ref, o_ref):
    # x_ref: (tm, d)   y_ref: (tn, d)   xx_ref: (tm, 1)   yy_ref: (1, tn)
    # -2 * x @ y.T on the MXU (NT contraction, no explicit transpose), f32 acc.
    xy = lax.dot_general(
        x_ref[...], y_ref[...],
        dimension_numbers=(((1,), (1,)), ((), ())),
        preferred_element_type=jnp.float32,
    )  # (tm, tn)

    dist_sq = xx_ref[...] + yy_ref[...] - 2.0 * xy
    o_ref[...] = jnp.sqrt(jnp.maximum(dist_sq, 1e-12)).astype(o_ref.dtype)


def euclidean_dist(x, y, *, tm=None, tn=None):
    """Pallas equivalent of Euclidean_dist.forward.

    x: (m, d), y: (n, d)  ->  (m, n) pairwise Euclidean distances (float32).
    """
    m, d = x.shape
    n, d2 = y.shape
    assert d == d2, "feature dims must match"

    # Tile sizes: tm multiple of 8 (sublane), tn multiple of 128 (lane-dense
    # stores). 256 is a good default on v5e/v6e/v7x and keeps the per-step
    # operand footprint tiny even with full-d-resident tiles.
    if tm is None:
        tm = 256 if m >= 256 else _round_up(m, 8)
    if tn is None:
        tn = 256 if n >= 256 else 128

    m_p = _round_up(m, tm)
    n_p = _round_up(n, tn)

    # Hoisted row norms (f32 regardless of input dtype) -- computed once, not
    # per (i, j) tile inside the kernel.
    xx = jnp.sum(x.astype(jnp.float32) ** 2, axis=1, keepdims=True)        # (m, 1)
    yy = jnp.sum(y.astype(jnp.float32) ** 2, axis=1, keepdims=True).T      # (1, n)

    # Pad ragged edges up to tile multiples; padded rows/cols are sliced off.
    x_p = jnp.pad(x, ((0, m_p - m), (0, 0)))
    y_p = jnp.pad(y, ((0, n_p - n), (0, 0)))
    xx_p = jnp.pad(xx, ((0, m_p - m), (0, 0)))
    yy_p = jnp.pad(yy, ((0, 0), (0, n_p - n)))

    grid = (m_p // tm, n_p // tn)

    out = pl.pallas_call(
        _euclid_dist_kernel,
        out_shape=jax.ShapeDtypeStruct((m_p, n_p), jnp.float32),
        grid_spec=pltpu.PrefetchScalarGridSpec(
            num_scalar_prefetch=0,
            grid=grid,
            in_specs=[
                pl.BlockSpec((tm, d), lambda i, j: (i, 0)),   # x tile
                pl.BlockSpec((tn, d), lambda i, j: (j, 0)),   # y tile
                pl.BlockSpec((tm, 1), lambda i, j: (i, 0)),   # xx tile
                pl.BlockSpec((1, tn), lambda i, j: (0, j)),   # yy tile
            ],
            out_specs=pl.BlockSpec((tm, tn), lambda i, j: (i, j)),
        ),
        compiler_params=pltpu.CompilerParams(
            dimension_semantics=("parallel", "parallel"),
            # Safe on all generations (v7x physical VMEM = 64 MiB); well above
            # the v5e 16 MiB scoped default so pipelining depth is not lost.
            vmem_limit_bytes=48 * 1024 * 1024,
        ),
        cost_estimate=pl.CostEstimate(
            flops=2 * m_p * n_p * d,
            transcendentals=m_p * n_p,
            bytes_accessed=4 * (m_p * d + n_p * d + m_p * n_p),
        ),
    )(x_p, y_p, xx_p, yy_p)

    return out[:m, :n]


def _reference(x, y):
    xf = x.astype(jnp.float32)
    yf = y.astype(jnp.float32)
    xx = jnp.sum(xf * xf, axis=1, keepdims=True)
    yy = jnp.sum(yf * yf, axis=1, keepdims=True)
    return jnp.sqrt(jnp.maximum(xx + yy.T - 2.0 * (xf @ yf.T), 1e-12))


if __name__ == "__main__":
    key = jax.random.PRNGKey(0)
    k1, k2, k3, k4 = jax.random.split(key, 4)

    # Case 1: small, aligned shapes consistent with the module.
    m, n, d = 8, 16, 128
    x = jax.random.normal(k1, (m, d), dtype=jnp.float32)
    y = jax.random.normal(k2, (n, d), dtype=jnp.float32)
    dist = jax.block_until_ready(euclidean_dist(x, y))
    assert dist.shape == (m, n)
    assert jnp.allclose(dist, _reference(x, y), atol=1e-4, rtol=1e-4)

    # Case 2: ragged (non-tile-multiple) shapes to exercise padding + 2-D grid.
    m2, n2, d2 = 40, 200, 96
    x2 = jax.random.normal(k3, (m2, d2), dtype=jnp.float32)
    y2 = jax.random.normal(k4, (n2, d2), dtype=jnp.float32)
    dist2 = jax.block_until_ready(euclidean_dist(x2, y2))
    assert dist2.shape == (m2, n2)
    assert jnp.allclose(dist2, _reference(x2, y2), atol=1e-4, rtol=1e-4)

    print("KERNEL_OK")
</pallas_src>

<mosaic_0001>
module attributes {stable_mosaic.version = 11 : i64} {
  func.func @_euclid_dist_kernel(%arg0: i32, %arg1: i32, %arg2: memref<8x128xf32, #tpu.memory_space<vmem>>, %arg3: memref<128x128xf32, #tpu.memory_space<vmem>>, %arg4: memref<8x1xf32, #tpu.memory_space<vmem>>, %arg5: memref<1x128xf32, #tpu.memory_space<vmem>>, %arg6: memref<8x128xf32, #tpu.memory_space<vmem>>) attributes {dimension_semantics = [#tpu.dimension_semantics<parallel>, #tpu.dimension_semantics<parallel>], iteration_bounds = array<i64: 1, 1>, scalar_prefetch = 0 : i64, scratch_operands = 0 : i64, tpu.core_type = #tpu.core_type<tc>, window_params = [{transform_indices = @transform_0, window_bounds = array<i64: 8, 128>}, {transform_indices = @transform_1, window_bounds = array<i64: 128, 128>}, {transform_indices = @transform_2, window_bounds = array<i64: 8, 1>}, {transform_indices = @transform_3, window_bounds = array<i64: 1, 128>}, {transform_indices = @transform_4, window_bounds = array<i64: 8, 128>}]} {
    %c0 = arith.constant 0 : index
    %c0_0 = arith.constant 0 : index
    %0 = vector.load %arg2[%c0, %c0_0] : memref<8x128xf32, #tpu.memory_space<vmem>>, vector<8x128xf32>
    %c0_1 = arith.constant 0 : index
    %c0_2 = arith.constant 0 : index
    %1 = vector.load %arg3[%c0_1, %c0_2] : memref<128x128xf32, #tpu.memory_space<vmem>>, vector<128x128xf32>
    %cst = arith.constant dense<0.000000e+00> : vector<8x128xf32>
    %2 = tpu.matmul %0, %1, %cst {dimension_numbers = #tpu.dot_dimension_numbers<[1], [1], [0], [0], [0, 0, 1, 0], [], []>} : vector<8x128xf32>, vector<128x128xf32>, vector<8x128xf32> -> vector<8x128xf32>
    %c0_3 = arith.constant 0 : index
    %c0_4 = arith.constant 0 : index
    %3 = vector.load %arg4[%c0_3, %c0_4] : memref<8x1xf32, #tpu.memory_space<vmem>>, vector<8x1xf32>
    %c0_5 = arith.constant 0 : index
    %c0_6 = arith.constant 0 : index
    %4 = vector.load %arg5[%c0_5, %c0_6] : memref<1x128xf32, #tpu.memory_space<vmem>>, vector<1x128xf32>
    %5 = vector.broadcast %3 : vector<8x1xf32> to vector<8x128xf32>
    %6 = vector.broadcast %4 : vector<1x128xf32> to vector<8x128xf32>
    %7 = arith.addf %5, %6 : vector<8x128xf32>
    %cst_7 = arith.constant 2.000000e+00 : f32
    %8 = vector.broadcast %cst_7 : f32 to vector<8x128xf32>
    %9 = arith.mulf %8, %2 : vector<8x128xf32>
    %10 = arith.subf %7, %9 : vector<8x128xf32>
    %cst_8 = arith.constant 9.99999996E-13 : f32
    %11 = vector.broadcast %cst_8 : f32 to vector<8x128xf32>
    %12 = arith.maximumf %10, %11 : vector<8x128xf32>
    %13 = math.sqrt %12 : vector<8x128xf32>
    %c0_9 = arith.constant 0 : index
    %c0_10 = arith.constant 0 : index
    %14 = vector.load %arg6[%c0_9, %c0_10] : memref<8x128xf32, #tpu.memory_space<vmem>>, vector<8x128xf32>
    tpu.vector_store %arg6[%c0_9, %c0_10], %13 {strides = array<i32>} : memref<8x128xf32, #tpu.memory_space<vmem>>, vector<8x128xf32>,
    return
  }
  func.func @transform_0(%arg0: i32, %arg1: i32) -> (i32, i32) {
    %c0_i32 = arith.constant 0 : i32
    %c0_i32_0 = arith.constant 0 : i32
    return %arg0, %c0_i32 : i32, i32
  }
  func.func @transform_1(%arg0: i32, %arg1: i32) -> (i32, i32) {
    %c0_i32 = arith.constant 0 : i32
    %c0_i32_0 = arith.constant 0 : i32
    return %arg1, %c0_i32 : i32, i32
  }
  func.func @transform_2(%arg0: i32, %arg1: i32) -> (i32, i32) {
    %c0_i32 = arith.constant 0 : i32
    %c0_i32_0 = arith.constant 0 : i32
    return %arg0, %c0_i32 : i32, i32
  }
  func.func @transform_3(%arg0: i32, %arg1: i32) -> (i32, i32) {
    %c0_i32 = arith.constant 0 : i32
    %c0_i32_0 = arith.constant 0 : i32
    return %c0_i32, %arg1 : i32, i32
  }
  func.func @transform_4(%arg0: i32, %arg1: i32) -> (i32, i32) {
    %c0_i32 = arith.constant 0 : i32
    return %arg0, %arg1 : i32, i32
  }
}

</mosaic_0001>

<bundles_post_ra>
// kernel: tpu_custom_call.1
= control target key start
LH: loop header
LB: loop body
LE: loop exit
PB: predicated region body
PF: predicated region fallthrough
CT: control target
= control target key end

     0   :  { %9 = vsyncpa [#allocation3], 0  ;;  %s313_s0 = inlined_call_operand.vmem [shape: f32[8,128], index: 0, kind: input, shape index: {}]   ;;  %s314_s1 = inlined_call_operand.hbm [shape: f32[128,128], index: 1, kind: input, shape index: {}]   ;;  %s315_s2 = inlined_call_operand.vmem [shape: f32[8,1], index: 2, kind: input, shape index: {}]   ;;  %s316_s3 = inlined_call_operand.vmem [shape: f32[1,128], index: 3, kind: input, shape index: {}]   ;;  %s317_s4 = inlined_call_operand.hbm [shape: f32[8,128], index: 4, kind: output, shape index: {}]  }
   0x1   :  { %10 = vsyncpa [#allocation4], 0  ;;  %s266_s15 = smov [#allocation2]  }
   0x2   :  { %s18_s16 = sshll.u32 %s266_s15, 4  ;;  %s19_s16 = int_to_ptr.vmem [resolvable:$true] %s18_s16 }
   0x3   :  { %s230_s17 = scalar_lea.vmem %s19_s16, 2048  ;;  %p235_p1 = scmp.lt.s32.totalorder %s19_s16, %s19_s16 }
   0x4   :  { %p231_p0 = scmp.ne.s32.totalorder %s19_s16, %s230_s17  ;;  %p236_p2 = scmp.lt.s32.totalorder %s230_s17, %s230_s17 }
   0x6   :  { %p237_p3 = por %p236_p2, %p235_p1 }
   0x8   :  { %p238_p4 = pnand %p237_p3, %p231_p0 }
   0xa   :  { %241 = shalt.err (!%p238_p4)
}
   0xb   :  { %s267_s18 = smov 128   ;;  %s268_s19 = smov 8  }
   0xc   :  { %24 = dma.hbm_to_vmem [thread:$0]  %s314_s1, 2048, %s19_s16, [#allocation3], %s267_s18, %s267_s18, %s268_s19  }
   0xd   :  { %262 = dma.done.wait [#allocation3], 2048  }
   0xe   :  { %263 = vsyncadd [#allocation3], 4294965248  ;;  %v269_v0 = vmov 0.0   ;;  %vm270_vm0 = vmmov 0   ;;  %v271_v1 = vmov 0   ;;  %v48_v2 = vld [vmem:[#allocation2 + $0x78] sm:$0xff] }
   0xf   :  { %177 = vmatprep.subr.mxu0 %v269_v0  ;;  %209 = vmatprep.mubr.msk.f32.mxu0 %vm270_vm0, %v269_v0  ;;  %v47_v3 = vld [vmem:[#allocation2 + $0x70] sm:$0xff]  ;;  %v119_v4 = vld [vmem:[%s315_s2] sm:$0xff]  ;;  %v46_v5 = vld [vmem:[#allocation2 + $0x68] sm:$0xff]  ;;  %s272_s26 = smov [#allocation5]  }
  0x10   :  { %219 = vset.pattern.permute.xlu0 %v271_v1  ;;  %178 = vmatpush3.xpose.msra.mxu0 %v48_v2  ;;  %v45_v6 = vld [vmem:[#allocation2 + $0x60] sm:$0xff]  ;;  %v44_v7 = vld [vmem:[#allocation2 + $0x58] sm:$0xff]  ;;  %v43_v8 = vld [vmem:[#allocation2 + $0x50] sm:$0xff]  ;;  %s150_s27 = sshll.u32 %s272_s26, 4  ;;  %s151_s27 = int_to_ptr.vmem [resolvable:$true] %s150_s27 }
  0x11   :  { %179 = vmatprep.subr.mxu0 %v269_v0  ;;  %123 = vperm.xlu0 %219, %v119_v4   ;;  %v42_v9 = vld [vmem:[#allocation2 + $0x48] sm:$0xff]  ;;  %v41_v10 = vld [vmem:[#allocation2 + $0x40] sm:$0xff]  ;;  %v40_v11 = vld [vmem:[#allocation2 + $0x38] sm:$0xff]  ;;  %p247_p6 = scmp.lt.s32.totalorder %s151_s27, %s151_s27 }
  0x12   :  { %v39_v12 = vld [vmem:[#allocation2 + $0x30] sm:$0xff]  ;;  %v38_v13 = vld [vmem:[#allocation2 + $0x28] sm:$0xff]  ;;  %v37_v14 = vld [vmem:[#allocation2 + $0x20] sm:$0xff] }
  0x13   :  { %v36_v15 = vld [vmem:[#allocation2 + $0x18] sm:$0xff]  ;;  %v35_v16 = vld [vmem:[#allocation2 + $0x10] sm:$0xff]  ;;  %v34_v17 = vld [vmem:[#allocation2 + $0x8] sm:$0xff] }
  0x14   :  { %180 = vmatpush3.xpose.msra.mxu0 %v47_v3  ;;  %v33_v18 = vld [vmem:[#allocation2] sm:$0xff] }
  0x15   :  { %181 = vmatprep.subr.mxu0 %v269_v0  ;;  %v32_v19 = vld [vmem:[%s313_s0] sm:$0xff]  ;;  %s242_s0 = scalar_lea.vmem %s151_s27, 128 }
  0x16   :  { %v159_v20 = vld [vmem:[%s316_s3] ss:$0 sm:$0xff]  ;;  %p243_p5 = scmp.ne.s32.totalorder %s151_s27, %s242_s0  ;;  %p248_p7 = scmp.lt.s32.totalorder %s242_s0, %s242_s0 }
  0x18   :  { %182 = vmatpush3.xpose.msra.mxu0 %v46_v5  ;;  %p249_p8 = por %p248_p7, %p247_p6 }
  0x19   :  { %183 = vmatprep.subr.mxu0 %v269_v0 }
  0x1a   :  { %p250_p9 = pnand %p249_p8, %p243_p5 }
  0x1c   :  { %184 = vmatpush3.xpose.msra.mxu0 %v45_v6 }
  0x1d   :  { %185 = vmatprep.subr.mxu0 %v269_v0 }
  0x20   :  { %186 = vmatpush3.xpose.msra.mxu0 %v44_v7 }
  0x21   :  { %187 = vmatprep.subr.mxu0 %v269_v0 }
  0x24   :  { %188 = vmatpush3.xpose.msra.mxu0 %v43_v8 }
  0x25   :  { %189 = vmatprep.subr.mxu0 %v269_v0 }
  0x28   :  { %190 = vmatpush3.xpose.msra.mxu0 %v42_v9 }
  0x29   :  { %191 = vmatprep.subr.mxu0 %v269_v0 }
  0x2c   :  { %192 = vmatpush3.xpose.msra.mxu0 %v41_v10 }
  0x2d   :  { %193 = vmatprep.subr.mxu0 %v269_v0 }
  0x30   :  { %194 = vmatpush3.xpose.msra.mxu0 %v40_v11 }
  0x31   :  { %195 = vmatprep.subr.mxu0 %v269_v0 }
  0x34   :  { %196 = vmatpush3.xpose.msra.mxu0 %v39_v12 }
  0x35   :  { %197 = vmatprep.subr.mxu0 %v269_v0 }
  0x38   :  { %198 = vmatpush3.xpose.msra.mxu0 %v38_v13 }
  0x39   :  { %199 = vmatprep.subr.mxu0 %v269_v0 }
  0x3c   :  { %200 = vmatpush3.xpose.msra.mxu0 %v37_v14 }
  0x3d   :  { %201 = vmatprep.subr.mxu0 %v269_v0 }
  0x40   :  { %202 = vmatpush3.xpose.msra.mxu0 %v36_v15 }
  0x41   :  { %203 = vmatprep.subr.mxu0 %v269_v0 }
  0x44   :  { %204 = vmatpush3.xpose.msra.mxu0 %v35_v16 }
  0x45   :  { %205 = vmatprep.subr.mxu0 %v269_v0 }
  0x48   :  { %206 = vmatpush3.xpose.msra.mxu0 %v34_v17 }
  0x49   :  { %207 = vmatprep.subr.mxu0 %v269_v0 }
  0x4c   :  { %208 = vmatpush3.xpose.msra.mxu0 %v33_v18 }
  0x4f   :  { %210 = vmatmul.mubr.f32.vlgmr.msra.gmra.mxu0 %v32_v19 }
  0x8c   :  { %v124_v21 = vpop.permute.xlu0 %123 }
  0x8d   :  { %v132_v22 = vadd.f32 %v159_v20, %v124_v21 }
 0x10f   :  { %v115_v23 = vpop.f32.mrf.mxu0 }
 0x110   :  { %v133_v24 = vmul.f32 2.0, %v115_v23 }
 0x111   :  { %v211_v25 = vpop.f32.mrf.mxu0 }
 0x112   :  { %v134_v26 = vsub.f32 %v132_v22, %v133_v24 }
 0x114   :  { %v135_v27 = vmax.f32 %v134_v26, 1e-12 }
 0x116   :  { %220 = vrsqrt.f32 %v135_v27  ;;  %vm138_vm1 = vcmp.eq.f32.partialorder %v135_v27, inf  ;;  %v141_v30 = vand.u32 2147483648, %v135_v27  ;;  %vm140_vm2 = vcmp.eq.f32.partialorder %v135_v27, 0.0 }
 0x123   :  { %v221_v28 = vpop.eup %220 }
 0x124   :  { %v137_v29 = vmul.f32 %v221_v28, %v135_v27 }
 0x126   :  { %v139_v31 = vsel %vm138_vm1, %v135_v27, %v137_v29 }
 0x127   :  { %v142_v32 = vsel %vm140_vm2, %v141_v30, %v139_v31 }
 0x128   :  { %143 = vst [vmem:[#allocation5] sm:$0xff] %v142_v32 }
 0x129   :  { %253 = shalt.err (!%p250_p9)
}
 0x12a   :  { %153 = dma.vmem_to_hbm [thread:$0]  %s151_s27, 128, %s317_s4, [#allocation4]  }
 0x12b   :  { %264 = dma.done.wait [#allocation4], 128  }
 0x12c   :  { %265 = vsyncadd [#allocation4], 4294967168 }
 0x12d   :  { %157 = vsyncpa [#allocation3], 1 }
 0x12e   :  { %158 = vsyncpa [#allocation4], 1 }

</bundles_post_ra>
